<compile_context>
chip_gen: v7x
topology: tpu7x:2x2x1
jax: 0.10.0
libtpu: 0.0.40
codegen_flags: <defaults>
</compile_context>

<pallas_src>
import functools

import jax
import jax.numpy as jnp
from jax.experimental import pallas as pl
from jax.experimental.pallas import tpu as pltpu


def _vmem():
    # Full-array block resident in VMEM (all operands here are <=128x256 f32).
    return pl.BlockSpec(memory_space=pltpu.MemorySpace.VMEM)


# ------------------------------------------------------------------------
# Fused kernel: perm features + LRP layer + degnet + final_predict + readout
# ------------------------------------------------------------------------
def lrp_fused_kernel(a_ref, nfeat_ref, efeat_ref, pool_ref, degs_ref,
                     w2_ref, b_ref, d0wT_ref, d0b_ref, d1wT_ref, d1b_ref,
                     fwT_ref, fb_ref, out_ref,
                     *, lrp_length, num_groups, num_nodes):
    L, B = lrp_length, num_groups

    # perm-length features: single MXU matmul  [P, N+E] @ [N+E, Din]
    feats = jnp.concatenate([nfeat_ref[...], efeat_ref[...]], axis=0)        # [N+E, Din]
    perm = jnp.dot(a_ref[...], feats, preferred_element_type=jnp.float32)    # [L*B, Din], row = l*B + b

    # sublane -> lane relayout without jnp.reshape:
    #   x[b, l*Din + d] = perm[l*B + b, d]
    # (static sublane-aligned slices + one lane-axis concat)
    x = jnp.concatenate([perm[l * B:(l + 1) * B, :] for l in range(L)],
                        axis=1)                                              # [B, L*Din]

    # LRP layer body: einsum('dab,bca->dc') flattened over (a, b)
    h = jnp.dot(x, w2_ref[...], preferred_element_type=jnp.float32) + b_ref[...]
    h = jnp.maximum(h, 0.0)                                                  # [B, H]
    h = jnp.dot(pool_ref[...], h, preferred_element_type=jnp.float32)        # [Nn, H]

    # degnet_0 is Linear(1, 2H): the K=1 matmul is a VPU broadcast multiply.
    y = jnp.maximum(degs_ref[...] * d0wT_ref[...] + d0b_ref[...], 0.0)       # [Nn, 2H]
    f = jnp.dot(y, d1wT_ref[...], preferred_element_type=jnp.float32) + d1b_ref[...]  # [Nn, H]

    h = jnp.maximum(h * f, 0.0)                                              # [Nn, H]

    # sum_nodes(final_predict(h)) == (sum_n h) @ fw.T + Nn * fb
    hsum = jnp.sum(h, axis=0, keepdims=True)                                 # [1, H]
    out_ref[...] = (jnp.dot(hsum, fwT_ref[...], preferred_element_type=jnp.float32)
                    + float(num_nodes) * fb_ref[...])                        # [1, T]


# ------------------------------------------------------------------------
# One-time preparation (hoisted out of the forward path)
# ------------------------------------------------------------------------
def prepare_params(params, *, lrp_length, lrp_in_dim):
    """Pre-transpose / reshape all parameters into the kernel's layout."""
    L, Din = lrp_length, lrp_in_dim
    H = params["weights"].shape[1]
    return dict(
        # w2[l*Din + d, c] = weights[d, c, l]  (matches x's flattened columns)
        w2=jnp.transpose(params["weights"], (2, 0, 1)).reshape(L * Din, H),
        bias=params["bias"],                 # [1, H]
        d0wT=params["d0w"].T,                # [1, 2H]
        d0b=params["d0b"][None, :],          # [1, 2H]
        d1wT=params["d1w"].T,                # [2H, H]
        d1b=params["d1b"][None, :],          # [1, H]
        fwT=params["fw"].T,                  # [H, T]
        fb=params["fb"][None, :],            # [1, T]
    )


def prepare_structure(n2p, e2p, *, lrp_length):
    """Concatenate [n2p | e2p] and row-permute b*L + l -> l*B + b (done once)."""
    P = n2p.shape[0]
    L = lrp_length
    B = P // L
    a = jnp.concatenate([n2p, e2p], axis=1)                 # [P, N+E]
    return a.reshape(B, L, a.shape[1]).transpose(1, 0, 2).reshape(P, a.shape[1])


# ------------------------------------------------------------------------
# Forward: exactly one pallas_call, no per-call layout ops
# ------------------------------------------------------------------------
def lrp_synthetic_forward(prep, a_perm, nfeat, efeat, pooling, degs_col,
                          *, lrp_length):
    B = a_perm.shape[0] // lrp_length
    n_nodes = pooling.shape[0]
    T = prep["fwT"].shape[1]
    kernel = functools.partial(lrp_fused_kernel,
                               lrp_length=lrp_length,
                               num_groups=B,
                               num_nodes=n_nodes)
    return pl.pallas_call(
        kernel,
        out_shape=jax.ShapeDtypeStruct((1, T), jnp.float32),
        in_specs=[_vmem()] * 13,
        out_specs=_vmem(),
    )(a_perm, nfeat, efeat, pooling, degs_col,
      prep["w2"], prep["bias"], prep["d0wT"], prep["d0b"],
      prep["d1wT"], prep["d1b"], prep["fwT"], prep["fb"])


# ------------------------------------------------------------------------
# Pure-JAX reference (mirrors the PyTorch forward exactly)
# ------------------------------------------------------------------------
def reference_forward(params, nfeat, efeat, pooling, degs, n2p, e2p,
                      *, lrp_length, lrp_in_dim):
    L, Din = lrp_length, lrp_in_dim
    perm = n2p @ nfeat + e2p @ efeat                       # [P, Din]
    x = perm.T.reshape(Din, -1, L).transpose(1, 2, 0)      # [B, L, Din]
    h = jax.nn.relu(jnp.einsum("dab,bca->dc", x, params["weights"]) + params["bias"])
    h = pooling @ h
    fd = jax.nn.relu(degs[:, None] @ params["d0w"].T + params["d0b"])
    fd = fd @ params["d1w"].T + params["d1b"]
    h = jax.nn.relu(h * fd)
    logits = h @ params["fw"].T + params["fb"]
    return jnp.sum(logits, axis=0, keepdims=True)


if __name__ == "__main__":
    # Small synthetic shapes consistent with the module defaults.
    N, E = 8, 16            # nodes, edges
    L, Din = 16, 2          # lrp_length, lrp_in_dim
    H, T = 128, 1           # hid_dim, num_tasks
    B = 8                   # number of permutation groups
    P = B * L               # total perm-length rows

    key = jax.random.PRNGKey(0)
    ks = jax.random.split(key, 12)

    nfeat = jax.random.normal(ks[0], (N, Din), jnp.float32)        # graph.ndata['feat']
    efeat = jax.random.normal(ks[1], (E, Din), jnp.float32)        # graph.edata['feat']
    n2p = (jax.random.uniform(ks[2], (P, N)) < 0.25).astype(jnp.float32)
    e2p = (jax.random.uniform(ks[3], (P, E)) < 0.25).astype(jnp.float32)
    pooling = (jax.random.uniform(ks[4], (N, B)) < 0.3).astype(jnp.float32)
    degs = jax.random.uniform(ks[5], (N,), jnp.float32) * 4.0

    # Deterministic parameter init (shapes from LRP_synthetic.__init__).
    params = dict(
        weights=jax.random.normal(ks[6], (Din, H, L), jnp.float32),   # nn.Parameter randn
        bias=jnp.zeros((1, H), jnp.float32),
        d0w=jax.random.normal(ks[7], (2 * H, 1), jnp.float32) * 0.5,  # degnet_0: Linear(1, 2H)
        d0b=jax.random.normal(ks[8], (2 * H,), jnp.float32) * 0.1,
        d1w=jax.random.normal(ks[9], (H, 2 * H), jnp.float32) * 0.1,  # degnet_1: Linear(2H, H)
        d1b=jax.random.normal(ks[10], (H,), jnp.float32) * 0.1,
        fw=jax.random.normal(ks[11], (T, H), jnp.float32) * 0.1,      # final_predict: Linear(H, T)
        fb=jnp.zeros((T,), jnp.float32),
    )

    # One-time prep (parameter layout + static graph structure + degs column).
    prep = jax.tree_util.tree_map(
        jax.block_until_ready,
        prepare_params(params, lrp_length=L, lrp_in_dim=Din))
    a_perm = jax.block_until_ready(prepare_structure(n2p, e2p, lrp_length=L))
    degs_col = jax.block_until_ready(degs[:, None])

    out = lrp_synthetic_forward(prep, a_perm, nfeat, efeat, pooling, degs_col,
                                lrp_length=L)
    out = jax.block_until_ready(out)

    ref = reference_forward(params, nfeat, efeat, pooling, degs, n2p, e2p,
                            lrp_length=L, lrp_in_dim=Din)

    assert out.shape == (1, T), out.shape
    assert jnp.allclose(out, ref, rtol=1e-3, atol=1e-3), (out, ref)
    print("KERNEL_OK")
</pallas_src>

<mosaic_0001>
module attributes {stable_mosaic.version = 11 : i64} {
  func.func @lrp_fused_kernel(%arg0: memref<128x24xf32, #tpu.memory_space<vmem>>, %arg1: memref<8x2xf32, #tpu.memory_space<vmem>>, %arg2: memref<16x2xf32, #tpu.memory_space<vmem>>, %arg3: memref<8x8xf32, #tpu.memory_space<vmem>>, %arg4: memref<8x1xf32, #tpu.memory_space<vmem>>, %arg5: memref<32x128xf32, #tpu.memory_space<vmem>>, %arg6: memref<1x128xf32, #tpu.memory_space<vmem>>, %arg7: memref<1x256xf32, #tpu.memory_space<vmem>>, %arg8: memref<1x256xf32, #tpu.memory_space<vmem>>, %arg9: memref<256x128xf32, #tpu.memory_space<vmem>>, %arg10: memref<1x128xf32, #tpu.memory_space<vmem>>, %arg11: memref<128x1xf32, #tpu.memory_space<vmem>>, %arg12: memref<1x1xf32, #tpu.memory_space<vmem>>, %arg13: memref<1x1xf32, #tpu.memory_space<vmem>>) attributes {dimension_semantics = [], scalar_prefetch = 0 : i64, scratch_operands = 0 : i64, tpu.core_type = #tpu.core_type<tc>} {
    %c0 = arith.constant 0 : index
    %c0_0 = arith.constant 0 : index
    %0 = vector.load %arg1[%c0, %c0_0] : memref<8x2xf32, #tpu.memory_space<vmem>>, vector<8x2xf32>
    %c0_1 = arith.constant 0 : index
    %c0_2 = arith.constant 0 : index
    %1 = vector.load %arg2[%c0_1, %c0_2] : memref<16x2xf32, #tpu.memory_space<vmem>>, vector<16x2xf32>
    %2 = tpu.concatenate %0, %1 in 0 : vector<8x2xf32>, vector<16x2xf32> -> vector<24x2xf32>
    %c0_3 = arith.constant 0 : index
    %c0_4 = arith.constant 0 : index
    %3 = vector.load %arg0[%c0_3, %c0_4] : memref<128x24xf32, #tpu.memory_space<vmem>>, vector<128x24xf32>
    %cst = arith.constant dense<0.000000e+00> : vector<128x2xf32>
    %4 = tpu.matmul %3, %2, %cst {dimension_numbers = #tpu.dot_dimension_numbers<[1], [0], [0], [1], [0, 0, 1, 1], [], []>} : vector<128x24xf32>, vector<24x2xf32>, vector<128x2xf32> -> vector<128x2xf32>
    %5 = vector.extract_strided_slice %4 {offsets = [0, 0], sizes = [8, 2], strides = [1, 1]} : vector<128x2xf32> to vector<8x2xf32>
    %6 = vector.extract_strided_slice %4 {offsets = [8, 0], sizes = [8, 2], strides = [1, 1]} : vector<128x2xf32> to vector<8x2xf32>
    %7 = vector.extract_strided_slice %4 {offsets = [16, 0], sizes = [8, 2], strides = [1, 1]} : vector<128x2xf32> to vector<8x2xf32>
    %8 = vector.extract_strided_slice %4 {offsets = [24, 0], sizes = [8, 2], strides = [1, 1]} : vector<128x2xf32> to vector<8x2xf32>
    %9 = vector.extract_strided_slice %4 {offsets = [32, 0], sizes = [8, 2], strides = [1, 1]} : vector<128x2xf32> to vector<8x2xf32>
    %10 = vector.extract_strided_slice %4 {offsets = [40, 0], sizes = [8, 2], strides = [1, 1]} : vector<128x2xf32> to vector<8x2xf32>
    %11 = vector.extract_strided_slice %4 {offsets = [48, 0], sizes = [8, 2], strides = [1, 1]} : vector<128x2xf32> to vector<8x2xf32>
    %12 = vector.extract_strided_slice %4 {offsets = [56, 0], sizes = [8, 2], strides = [1, 1]} : vector<128x2xf32> to vector<8x2xf32>
    %13 = vector.extract_strided_slice %4 {offsets = [64, 0], sizes = [8, 2], strides = [1, 1]} : vector<128x2xf32> to vector<8x2xf32>
    %14 = vector.extract_strided_slice %4 {offsets = [72, 0], sizes = [8, 2], strides = [1, 1]} : vector<128x2xf32> to vector<8x2xf32>
    %15 = vector.extract_strided_slice %4 {offsets = [80, 0], sizes = [8, 2], strides = [1, 1]} : vector<128x2xf32> to vector<8x2xf32>
    %16 = vector.extract_strided_slice %4 {offsets = [88, 0], sizes = [8, 2], strides = [1, 1]} : vector<128x2xf32> to vector<8x2xf32>
    %17 = vector.extract_strided_slice %4 {offsets = [96, 0], sizes = [8, 2], strides = [1, 1]} : vector<128x2xf32> to vector<8x2xf32>
    %18 = vector.extract_strided_slice %4 {offsets = [104, 0], sizes = [8, 2], strides = [1, 1]} : vector<128x2xf32> to vector<8x2xf32>
    %19 = vector.extract_strided_slice %4 {offsets = [112, 0], sizes = [8, 2], strides = [1, 1]} : vector<128x2xf32> to vector<8x2xf32>
    %20 = vector.extract_strided_slice %4 {offsets = [120, 0], sizes = [8, 2], strides = [1, 1]} : vector<128x2xf32> to vector<8x2xf32>
    %21 = tpu.concatenate %5, %6, %7, %8, %9, %10, %11, %12, %13, %14, %15, %16, %17, %18, %19, %20 in 1 : vector<8x2xf32>, vector<8x2xf32>, vector<8x2xf32>, vector<8x2xf32>, vector<8x2xf32>, vector<8x2xf32>, vector<8x2xf32>, vector<8x2xf32>, vector<8x2xf32>, vector<8x2xf32>, vector<8x2xf32>, vector<8x2xf32>, vector<8x2xf32>, vector<8x2xf32>, vector<8x2xf32>, vector<8x2xf32> -> vector<8x32xf32>
    %c0_5 = arith.constant 0 : index
    %c0_6 = arith.constant 0 : index
    %22 = vector.load %arg5[%c0_5, %c0_6] : memref<32x128xf32, #tpu.memory_space<vmem>>, vector<32x128xf32>
    %cst_7 = arith.constant dense<0.000000e+00> : vector<8x128xf32>
    %23 = tpu.matmul %21, %22, %cst_7 {dimension_numbers = #tpu.dot_dimension_numbers<[1], [0], [0], [1], [0, 0, 1, 1], [], []>} : vector<8x32xf32>, vector<32x128xf32>, vector<8x128xf32> -> vector<8x128xf32>
    %c0_8 = arith.constant 0 : index
    %c0_9 = arith.constant 0 : index
    %24 = vector.load %arg6[%c0_8, %c0_9] : memref<1x128xf32, #tpu.memory_space<vmem>>, vector<1x128xf32>
    %25 = vector.broadcast %24 : vector<1x128xf32> to vector<8x128xf32>
    %26 = arith.addf %23, %25 : vector<8x128xf32>
    %cst_10 = arith.constant 0.000000e+00 : f32
    %27 = vector.broadcast %cst_10 : f32 to vector<8x128xf32>
    %28 = arith.maximumf %26, %27 : vector<8x128xf32>
    %c0_11 = arith.constant 0 : index
    %c0_12 = arith.constant 0 : index
    %29 = vector.load %arg3[%c0_11, %c0_12] : memref<8x8xf32, #tpu.memory_space<vmem>>, vector<8x8xf32>
    %cst_13 = arith.constant dense<0.000000e+00> : vector<8x128xf32>
    %30 = tpu.matmul %29, %28, %cst_13 {dimension_numbers = #tpu.dot_dimension_numbers<[1], [0], [0], [1], [0, 0, 1, 1], [], []>} : vector<8x8xf32>, vector<8x128xf32>, vector<8x128xf32> -> vector<8x128xf32>
    %c0_14 = arith.constant 0 : index
    %c0_15 = arith.constant 0 : index
    %31 = vector.load %arg4[%c0_14, %c0_15] : memref<8x1xf32, #tpu.memory_space<vmem>>, vector<8x1xf32>
    %c0_16 = arith.constant 0 : index
    %c0_17 = arith.constant 0 : index
    %32 = vector.load %arg7[%c0_16, %c0_17] : memref<1x256xf32, #tpu.memory_space<vmem>>, vector<1x256xf32>
    %33 = vector.broadcast %31 : vector<8x1xf32> to vector<8x256xf32>
    %34 = vector.broadcast %32 : vector<1x256xf32> to vector<8x256xf32>
    %35 = arith.mulf %33, %34 : vector<8x256xf32>
    %c0_18 = arith.constant 0 : index
    %c0_19 = arith.constant 0 : index
    %36 = vector.load %arg8[%c0_18, %c0_19] : memref<1x256xf32, #tpu.memory_space<vmem>>, vector<1x256xf32>
    %37 = vector.broadcast %36 : vector<1x256xf32> to vector<8x256xf32>
    %38 = arith.addf %35, %37 : vector<8x256xf32>
    %cst_20 = arith.constant 0.000000e+00 : f32
    %39 = vector.broadcast %cst_20 : f32 to vector<8x256xf32>
    %40 = arith.maximumf %38, %39 : vector<8x256xf32>
    %c0_21 = arith.constant 0 : index
    %c0_22 = arith.constant 0 : index
    %41 = vector.load %arg9[%c0_21, %c0_22] : memref<256x128xf32, #tpu.memory_space<vmem>>, vector<256x128xf32>
    %cst_23 = arith.constant dense<0.000000e+00> : vector<8x128xf32>
    %42 = tpu.matmul %40, %41, %cst_23 {dimension_numbers = #tpu.dot_dimension_numbers<[1], [0], [0], [1], [0, 0, 1, 1], [], []>} : vector<8x256xf32>, vector<256x128xf32>, vector<8x128xf32> -> vector<8x128xf32>
    %c0_24 = arith.constant 0 : index
    %c0_25 = arith.constant 0 : index
    %43 = vector.load %arg10[%c0_24, %c0_25] : memref<1x128xf32, #tpu.memory_space<vmem>>, vector<1x128xf32>
    %44 = vector.broadcast %43 : vector<1x128xf32> to vector<8x128xf32>
    %45 = arith.addf %42, %44 : vector<8x128xf32>
    %46 = arith.mulf %30, %45 : vector<8x128xf32>
    %cst_26 = arith.constant 0.000000e+00 : f32
    %47 = vector.broadcast %cst_26 : f32 to vector<8x128xf32>
    %48 = arith.maximumf %46, %47 : vector<8x128xf32>
    %cst_27 = arith.constant dense<0.000000e+00> : vector<128xf32>
    %49 = vector.multi_reduction <add>, %48, %cst_27 [0] : vector<8x128xf32> to vector<128xf32>
    %50 = vector.shape_cast %49 : vector<128xf32> to vector<1x128xf32>
    %c0_28 = arith.constant 0 : index
    %c0_29 = arith.constant 0 : index
    %51 = vector.load %arg11[%c0_28, %c0_29] : memref<128x1xf32, #tpu.memory_space<vmem>>, vector<128x1xf32>
    %cst_30 = arith.constant dense<0.000000e+00> : vector<1x1xf32>
    %52 = tpu.matmul %50, %51, %cst_30 {dimension_numbers = #tpu.dot_dimension_numbers<[1], [0], [0], [1], [0, 0, 1, 1], [], []>} : vector<1x128xf32>, vector<128x1xf32>, vector<1x1xf32> -> vector<1x1xf32>
    %c0_31 = arith.constant 0 : index
    %c0_32 = arith.constant 0 : index
    %53 = vector.load %arg12[%c0_31, %c0_32] : memref<1x1xf32, #tpu.memory_space<vmem>>, vector<1x1xf32>
    %cst_33 = arith.constant 8.000000e+00 : f32
    %54 = vector.broadcast %cst_33 : f32 to vector<1x1xf32>
    %55 = arith.mulf %54, %53 : vector<1x1xf32>
    %56 = arith.addf %52, %55 : vector<1x1xf32>
    %c0_34 = arith.constant 0 : index
    %c0_35 = arith.constant 0 : index
    %57 = vector.load %arg13[%c0_34, %c0_35] : memref<1x1xf32, #tpu.memory_space<vmem>>, vector<1x1xf32>
    tpu.vector_store %arg13[%c0_34, %c0_35], %56 {strides = array<i32>} : memref<1x1xf32, #tpu.memory_space<vmem>>, vector<1x1xf32>,
    return
  }
}

</mosaic_0001>

<bundles_post_ra>
// kernel: tpu_custom_call.1
= control target key start
LH: loop header
LB: loop body
LE: loop exit
PB: predicated region body
PF: predicated region fallthrough
CT: control target
= control target key end

     0   :  { %s1432_s0 = inlined_call_operand.vmem [shape: f32[128,24], index: 0, kind: input, shape index: {}]   ;;  %s1433_s1 = inlined_call_operand.vmem [shape: f32[8,2], index: 1, kind: input, shape index: {}]   ;;  %s1434_s2 = inlined_call_operand.vmem [shape: f32[16,2], index: 2, kind: input, shape index: {}]   ;;  %s1435_s3 = inlined_call_operand.vmem [shape: f32[8,8], index: 3, kind: input, shape index: {}]   ;;  %s1436_s4 = inlined_call_operand.vmem [shape: f32[8,1], index: 4, kind: input, shape index: {}]   ;;  %s1437_s5 = inlined_call_operand.vmem [shape: f32[32,128], index: 5, kind: input, shape index: {}]   ;;  %s1438_s6 = inlined_call_operand.vmem [shape: f32[1,128], index: 6, kind: input, shape index: {}]   ;;  %s1439_s7 = inlined_call_operand.vmem [shape: f32[1,256], index: 7, kind: input, shape index: {}]   ;;  %s1440_s8 = inlined_call_operand.vmem [shape: f32[1,256], index: 8, kind: input, shape index: {}]   ;;  %s1441_s9 = inlined_call_operand.vmem [shape: f32[256,128], index: 9, kind: input, shape index: {}]   ;;  %s1442_s10 = inlined_call_operand.vmem [shape: f32[1,128], index: 10, kind: input, shape index: {}]   ;;  %s1443_s11 = inlined_call_operand.vmem [shape: f32[128,1], index: 11, kind: input, shape index: {}]   ;;  %s1444_s12 = inlined_call_operand.<no memory space> [shape: f32[1,1], index: 12, kind: input, shape index: {}]   ;;  %s1445_s13 = inlined_call_operand.hbm [shape: f32[1,1], index: 13, kind: output, shape index: {}]  }
   0x1   :  { %v18_v0 = vstv %s1444_s12 }
   0x2   :  { %19 = vst [vmem:[#allocation2] sm:$0x1] %v18_v0 }
   0x3   :  { %v47_v1 = vld [vmem:[%s1433_s1] sm:$0xff]  ;;  %vm66_vm0 = vcmask 195584   ;;  %v49_v5 = vld [vmem:[%s1434_s2 + $0x8] sm:$0xff] }
   0x4   :  { %v48_v2 = vld [vmem:[%s1434_s2] sm:$0xff]  ;;  %v51_v6 = vld [vmem:[%s1432_s0 + $0x8] sm:$0xff] }
   0x5   :  { %v945_v3 = vpack.c.bf16 %v48_v2, %v47_v1  ;;  %v50_v4 = vld [vmem:[%s1432_s0] sm:$0xff] }
   0x6   :  { %870 = vmatprep.mubr.msk.f32.mxu0 %vm66_vm0, %v50_v4 }
   0x7   :  { %946 = vmatprep.subr.bf16.mxu0 %v945_v3 }
   0x8   :  { %948 = vmatpush3.bf16.msra.mxu0 %v945_v3 }
   0x9   :  { %868 = vmatprep.subr.mxu0 %v49_v5 }
   0xa   :  { %20 = vsyncpa [#allocation4], 0  ;;  %v52_v7 = vld [vmem:[%s1432_s0 + $0x10] sm:$0xff]  ;;  %v53_v8 = vld [vmem:[%s1432_s0 + $0x18] sm:$0xff]  ;;  %s1057_s25 = smov 2   ;;  %s1058_s26 = smov 6  }
   0xb   :  { %v54_v9 = vld [vmem:[%s1432_s0 + $0x20] sm:$0xff]  ;;  %v55_v10 = vld [vmem:[%s1432_s0 + $0x28] sm:$0xff]  ;;  %v56_v11 = vld [vmem:[%s1432_s0 + $0x30] sm:$0xff]  ;;  %s1059_s27 = smov 4   ;;  %s1060_s14 = smov 10   ;;  %v1062_v30 = vmov 0.0|0.0  }
   0xc   :  { %869 = vmatpush3.msra.mxu0 %v49_v5  ;;  %v57_v12 = vld [vmem:[%s1432_s0 + $0x38] sm:$0xff]  ;;  %v58_v13 = vld [vmem:[%s1432_s0 + $0x40] sm:$0xff]  ;;  %v59_v14 = vld [vmem:[%s1432_s0 + $0x48] sm:$0xff]  ;;  %s1061_s15 = smov 8   ;;  %949 = vmatprep.subr.bf16.mxu1 %v1062_v30  ;;  %s1063_s18 = smov 14   ;;  %vm1067_vm1 = vmmov 0  }
   0xd   :  { %871 = vmatmul.mubr.msk.f32.vlgmr.msra.gmra.mrb[0].mxu0 %vm66_vm0, %v51_v6  ;;  %v60_v15 = vld [vmem:[%s1432_s0 + $0x50] sm:$0xff]  ;;  %v61_v16 = vld [vmem:[%s1432_s0 + $0x58] sm:$0xff]  ;;  %v62_v17 = vld [vmem:[%s1432_s0 + $0x60] sm:$0xff]  ;;  %s1064_s19 = smov 12   ;;  %s1065_s2 = smov 18   ;;  %v1068_v38 = vmov 0.0  }
   0xe   :  { %873 = vmatprep.mubr.msk.f32.mxu0 %vm66_vm0, %v52_v7  ;;  %v63_v18 = vld [vmem:[%s1432_s0 + $0x68] sm:$0xff]  ;;  %v64_v19 = vld [vmem:[%s1432_s0 + $0x70] sm:$0xff]  ;;  %v65_v20 = vld [vmem:[%s1432_s0 + $0x78] sm:$0xff]  ;;  %s1066_s20 = smov 16   ;;  %902 = vmatprep.mubr.msk.f32.mxu1 %vm1067_vm1, %v1068_v38  ;;  %v1069_v42 = vmov 0   ;;  %s1070_s1 = smov 22  }
   0xf   :  { %v349_v27 = vld [vmem:[%s1437_s5] sm:$0xff]  ;;  %v350_v28 = vld [vmem:[%s1437_s5 + $0x8] sm:$0xff]  ;;  %v351_v33 = vld [vmem:[%s1437_s5 + $0x10] sm:$0xff]  ;;  %1031 = vset.pattern.permute.xlu1 %v1069_v42  ;;  %1032 = vset.pattern.permute.xlu0 %v1069_v42  ;;  %s1071_s12 = smov 20   ;;  %s1072_s24 = smov 26   ;;  %vm320_vm2 = vcmask 15360  }
  0x10   :  { %v950_v29 = vpack.c.bf16 %v350_v28, %v349_v27  ;;  %v352_v34 = vld [vmem:[%s1437_s5 + $0x18] sm:$0xff]  ;;  %v561_v39 = vld [vmem:[%s1441_s9 + $0x80] sm:$0xff]  ;;  %v562_v40 = vld [vmem:[%s1441_s9 + $0x88] sm:$0xff]  ;;  %s1074_s16 = smov 30   ;;  %s1075_s17 = smov 28   ;;  %vm322_vm3 = vcmask 31744  }
  0x11   :  { %874 = vmatmul.mubr.msk.f32.gmra.mrb[2].mxu0 %vm66_vm0, %v53_v8  ;;  %v953_v35 = vpack.c.bf16 %v352_v34, %v351_v33  ;;  %v955_v43 = vpack.c.bf16 %v562_v40, %v561_v39  ;;  %v545_v44 = vld [vmem:[%s1441_s9] sm:$0xff]  ;;  %v546_v45 = vld [vmem:[%s1441_s9 + $0x8] sm:$0xff]  ;;  %v563_v46 = vld [vmem:[%s1441_s9 + $0x90] sm:$0xff]  ;;  %vm324_vm4 = vcmask 48128   ;;  %vm326_vm5 = vcmask 64512  }
  0x12   :  { %876 = vmatprep.mubr.msk.f32.mxu0 %vm66_vm0, %v54_v9  ;;  %951 = vmatpush3.bf16.msra.mxu1 %v950_v29  ;;  %v957_v48 = vpack.c.bf16 %v546_v45, %v545_v44  ;;  %v564_v49 = vld [vmem:[%s1441_s9 + $0x98] sm:$0xff]  ;;  %v547_v50 = vld [vmem:[%s1441_s9 + $0x10] sm:$0xff]  ;;  %v565_v53 = vld [vmem:[%s1441_s9 + $0xa0] sm:$0xff]  ;;  %vm328_vm6 = vcmask 80896   ;;  %vm330_vm7 = vcmask 97280   ;;  %vm332_vm8 = vcmask 113664  }
  0x13   :  { %952 = vmatprep.subr.bf16.mxu1 %v1062_v30  ;;  %v548_v51 = vld [vmem:[%s1441_s9 + $0x18] sm:$0xff]  ;;  %v959_v52 = vpack.c.bf16 %v564_v49, %v563_v46  ;;  %v566_v54 = vld [vmem:[%s1441_s9 + $0xa8] sm:$0xff]  ;;  %956 = vmatprep.subr.bf16.mxu0 %v955_v43  ;;  %v549_v59 = vld [vmem:[%s1441_s9 + $0x20] sm:$0xff]  ;;  %vm334_vm9 = vcmask 130048   ;;  %vm336_vm10 = vcmask 146432   ;;  %vm338_vm11 = vcmask 162816  }
  0x14   :  { %958 = vmatpush3.bf16.msra.mxu0 %v957_v48  ;;  %v961_v56 = vpack.c.bf16 %v548_v51, %v547_v50  ;;  %v963_v58 = vpack.c.bf16 %v566_v54, %v565_v53  ;;  %v550_v60 = vld [vmem:[%s1441_s9 + $0x28] sm:$0xff]  ;;  %v567_v61 = vld [vmem:[%s1441_s9 + $0xb0] sm:$0xff]  ;;  %v568_v62 = vld [vmem:[%s1441_s9 + $0xb8] sm:$0xff]  ;;  %vm340_vm12 = vcmask 179200   ;;  %vm343_vm13 = vcmask 211968  }
  0x15   :  { %877 = vmatmul.mubr.msk.f32.gmra.mrb[4].mxu0 %vm66_vm0, %v55_v10  ;;  %960 = vmatprep.subr.bf16.mxu0 %v959_v52  ;;  %v965_v0 = vpack.c.bf16 %v550_v60, %v549_v59  ;;  %v967_v2 = vpack.c.bf16 %v568_v62, %v567_v61  ;;  %v551_v3 = vld [vmem:[%s1441_s9 + $0x30] sm:$0xff]  ;;  %v552_v4 = vld [vmem:[%s1441_s9 + $0x38] sm:$0xff]  ;;  %v569_v5 = vld [vmem:[%s1441_s9 + $0xc0] sm:$0xff]  ;;  %vm345_vm14 = vcmask 228352   ;;  %vm347_vm15 = vcmask 244736  }
  0x16   :  { %879 = vmatprep.mubr.msk.f32.mxu0 %vm66_vm0, %v56_v11  ;;  %954 = vmatpush3.bf16.msra.mxu1 %v953_v35  ;;  %v570_v6 = vld [vmem:[%s1441_s9 + $0xc8] sm:$0xff]  ;;  %v509_v7 = vld [vmem:[%s1436_s4] sm:$0xff]  ;;  %v969_v8 = vpack.c.bf16 %v552_v4, %v551_v3  ;;  %v559_v29 = vld [vmem:[%s1441_s9 + $0x70] sm:$0xff] }
  0x17   :  { %905 = vmatprep.subr.mxu1 %v1068_v38  ;;  %v971_v9 = vpack.c.bf16 %v570_v6, %v569_v5  ;;  %v553_v10 = vld [vmem:[%s1441_s9 + $0x40] sm:$0xff]  ;;  %v554_v11 = vld [vmem:[%s1441_s9 + $0x48] sm:$0xff] }
  0x18   :  { %962 = vmatpush3.bf16.msra.mxu0 %v961_v56  ;;  %v510_v3 = vld [vmem:[%s1439_s7] sm:$0x3] }
  0x19   :  { %880 = vmatmul.mubr.msk.f32.gmra.mrb[6].mxu0 %vm66_vm0, %v57_v12  ;;  %964 = vmatprep.subr.bf16.mxu0 %v963_v58  ;;  %v571_v12 = vld [vmem:[%s1441_s9 + $0xd0] sm:$0xff]  ;;  %v529_v4 = vld [vmem:[%s1440_s8] sm:$0x3] }
  0x1a   :  { %882 = vmatprep.mubr.msk.f32.mxu0 %vm66_vm0, %v58_v13  ;;  %v572_v13 = vld [vmem:[%s1441_s9 + $0xd8] sm:$0xff] }
  0x1c   :  { %966 = vmatpush3.bf16.msra.mxu0 %v965_v0 }
  0x1d   :  { %883 = vmatmul.mubr.msk.f32.gmra.mrb[8].mxu0 %vm66_vm0, %v59_v14  ;;  %968 = vmatprep.subr.bf16.mxu0 %v967_v2  ;;  %v973_v14 = vpack.c.bf16 %v554_v11, %v553_v10 }
  0x1e   :  { %885 = vmatprep.mubr.msk.f32.mxu0 %vm66_vm0, %v60_v15  ;;  %v975_v15 = vpack.c.bf16 %v572_v13, %v571_v12 }
  0x20   :  { %970 = vmatpush3.bf16.msra.mxu0 %v969_v8 }
  0x21   :  { %886 = vmatmul.mubr.msk.f32.gmra.mrb[10].mxu0 %vm66_vm0, %v61_v16  ;;  %972 = vmatprep.subr.bf16.mxu0 %v971_v9  ;;  %v555_v16 = vld [vmem:[%s1441_s9 + $0x50] sm:$0xff] }
  0x22   :  { %888 = vmatprep.mubr.msk.f32.mxu0 %vm66_vm0, %v62_v17  ;;  %v556_v17 = vld [vmem:[%s1441_s9 + $0x58] sm:$0xff] }
  0x24   :  { %974 = vmatpush3.bf16.msra.mxu0 %v973_v14 }
  0x25   :  { %889 = vmatmul.mubr.msk.f32.gmra.mrb[12].mxu0 %vm66_vm0, %v63_v18  ;;  %v573_v18 = vld [vmem:[%s1441_s9 + $0xe0] sm:$0xff]  ;;  %976 = vmatprep.subr.bf16.mxu0 %v975_v15 }
  0x26   :  { %891 = vmatprep.mubr.msk.f32.mxu0 %vm66_vm0, %v64_v19  ;;  %v574_v19 = vld [vmem:[%s1441_s9 + $0xe8] sm:$0xff] }
  0x29   :  { %892 = vmatmul.mubr.msk.f32.gmra.mrb[14].mxu0 %vm66_vm0, %v65_v20  ;;  %v977_v20 = vpack.c.bf16 %v556_v17, %v555_v16  ;;  %v782_v16 = vld [vmem:[%s1438_s6] ss:$0 sm:$0xff] }
  0x2b   :  { %978 = vmatpush3.bf16.msra.mxu0 %v977_v20 }
  0xe0   :  { %v872_v21 = vpop.f32.mrb[0].mxu0 }
  0xe1   :  { %261 = vrot.lane.b32.xlu0 %v872_v21, %s1057_s25  ;;  %v1223_v22 = vpop.f32.mrb[1].mxu0  ;;  %s1073_s25 = smov 24   ;;  %v979_v21 = vpack.c.bf16 %v574_v19, %v573_v18  ;;  %v662_v18 = vld [vmem:[%s1443_s11] sm:$0xff]  ;;  %v663_v19 = vld [vmem:[%s1443_s11 + $0x8] sm:$0xff] }
  0xe3   :  { %980 = vmatprep.subr.bf16.mxu0 %v979_v21 }
  0xe4   :  { %v875_v23 = vpop.f32.mrb[2].mxu0 }
  0xe5   :  { %269 = vrot.lane.b32.xlu1 %v875_v23, %s1058_s26  ;;  %v191_v24 = vpop.f32.mrb[3].mxu0  ;;  %v557_v23 = vld [vmem:[%s1441_s9 + $0x60] sm:$0xff] }
  0xe6   :  { %265 = vrot.lane.b32.xlu0 %v191_v24, %s1059_s27  ;;  %v558_v24 = vld [vmem:[%s1441_s9 + $0x68] sm:$0xff] }
  0xe7   :  { %v981_v27 = vpack.c.bf16 %v558_v24, %v557_v23  ;;  %v435_v24 = vld [vmem:[%s1435_s3] sm:$0xff] }
  0xe8   :  { %v878_v25 = vpop.f32.mrb[4].mxu0 }
  0xe9   :  { %v201_v26 = vpop.f32.mrb[5].mxu0  ;;  %982 = vmatpush3.bf16.msra.mxu0 %v981_v27  ;;  %v665_v27 = vld [vmem:[%s1443_s11 + $0x18] sm:$0xff] }
  0xea   :  { %277 = vrot.lane.b32.xlu0 %v878_v25, %s1060_s14  ;;  %273 = vrot.lane.b32.xlu1 %v201_v26, %s1061_s15  ;;  %v575_v25 = vld [vmem:[%s1441_s9 + $0xf0] sm:$0xff]  ;;  %v576_v26 = vld [vmem:[%s1441_s9 + $0xf8] sm:$0xff] }
  0xeb   :  { %v983_v28 = vpack.c.bf16 %v576_v26, %v575_v25  ;;  %v988_v25 = vpack.c.bf16 %v663_v19, %v662_v18  ;;  %v664_v26 = vld [vmem:[%s1443_s11 + $0x10] sm:$0xff] }
  0xec   :  { %v881_v31 = vpop.f32.mrb[6].mxu0 }
  0xed   :  { %v211_v32 = vpop.f32.mrb[7].mxu0  ;;  %984 = vmatprep.subr.bf16.mxu0 %v983_v28  ;;  %v991_v28 = vpack.c.bf16 %v665_v27, %v664_v26 }
  0xee   :  { %285 = vrot.lane.b32.xlu0 %v881_v31, %s1063_s18  ;;  %281 = vrot.lane.b32.xlu1 %v211_v32, %s1064_s19  ;;  %v560_v31 = vld [vmem:[%s1441_s9 + $0x78] sm:$0xff] }
  0xef   :  { %v985_v32 = vpack.c.bf16 %v560_v31, %v559_v29  ;;  %v666_v29 = vld [vmem:[%s1443_s11 + $0x20] sm:$0xff]  ;;  %v667_v31 = vld [vmem:[%s1443_s11 + $0x28] sm:$0xff] }
  0xf0   :  { %v884_v36 = vpop.f32.mrb[8].mxu0 }
  0xf1   :  { %v221_v37 = vpop.f32.mrb[9].mxu0  ;;  %986 = vmatpush3.bf16.msra.mxu0 %v985_v32  ;;  %v994_v32 = vpack.c.bf16 %v667_v31, %v666_v29 }
  0xf2   :  { %293 = vrot.lane.b32.xlu0 %v884_v36, %s1065_s2  ;;  %289 = vrot.lane.b32.xlu1 %v221_v37, %s1066_s20 }
  0xf4   :  { %v887_v41 = vpop.f32.mrb[10].mxu0 }
  0xf5   :  { %v231_v47 = vpop.f32.mrb[11].mxu0 }
  0xf6   :  { %301 = vrot.lane.b32.xlu0 %v887_v41, %s1070_s1  ;;  %297 = vrot.lane.b32.xlu1 %v231_v47, %s1071_s12 }
  0xf8   :  { %v890_v55 = vpop.f32.mrb[12].mxu0 }
  0xf9   :  { %v241_v57 = vpop.f32.mrb[13].mxu0 }
  0xfa   :  { %309 = vrot.lane.b32.xlu0 %v890_v55, %s1072_s24  ;;  %305 = vrot.lane.b32.xlu1 %v241_v57, %s1073_s25 }
  0xfc   :  { %v893_v63 = vpop.f32.mrb[14].mxu0 }
  0xfd   :  { %v251_v1 = vpop.f32.mrb[15].mxu0 }
  0xfe   :  { %317 = vrot.lane.b32.xlu0 %v893_v63, %s1074_s16  ;;  %313 = vrot.lane.b32.xlu1 %v251_v1, %s1075_s17  ;;  %v517_v63 = vlaneseq }
 0x100   :  { %v518_v0 = vshrl.u32 %v517_v63, 7 }
 0x102   :  { %513 = vperm.xlu1 %1031, %v509_v7   ;;  %v519_v1 = vsub.s32 0, %v518_v0  ;;  %v523_v2 = vsub.s32 1, %v518_v0 }
 0x104   :  { %v520_v5 = vrot.slane %v510_v3, %v519_v1  ;;  %v524_v6 = vrot.slane %v510_v3, %v523_v2  ;;  %v534_v7 = vrot.slane %v529_v4, %v519_v1  ;;  %v538_v8 = vrot.slane %v529_v4, %v523_v2 }
 0x153   :  { %v262_v33 = vpop.permute.xlu0 %261 }
 0x154   :  { %v321_v35 = vsel %vm320_vm2, %v1223_v22, %v262_v33  ;;  %vm360_vm2 = vcmask 261120   ;;  %v668_v33 = vld [vmem:[%s1443_s11 + $0x30] sm:$0xff] }
 0x157   :  { %v270_v34 = vpop.permute.xlu1 %269 }
 0x158   :  { %v266_v36 = vpop.permute.xlu0 %265 }
 0x159   :  { %v323_v37 = vsel %vm322_vm3, %v321_v35, %v266_v36 }
 0x15a   :  { %v325_v40 = vsel %vm324_vm4, %v323_v37, %v270_v34 }
 0x15c   :  { %v278_v39 = vpop.permute.xlu0 %277  ;;  %v274_v41 = vpop.permute.xlu1 %273 }
 0x15d   :  { %v327_v42 = vsel %vm326_vm5, %v325_v40, %v274_v41  ;;  %v671_v40 = vld [vmem:[%s1443_s11 + $0x48] sm:$0xff] }
 0x15e   :  { %v329_v44 = vsel %vm328_vm6, %v327_v42, %v278_v39  ;;  %v670_v39 = vld [vmem:[%s1443_s11 + $0x40] sm:$0xff]  ;;  %v672_v42 = vld [vmem:[%s1443_s11 + $0x50] sm:$0xff] }
 0x15f   :  { %v1000_v41 = vpack.c.bf16 %v671_v40, %v670_v39 }
 0x160   :  { %v286_v43 = vpop.permute.xlu0 %285  ;;  %v282_v45 = vpop.permute.xlu1 %281 }
 0x161   :  { %v331_v46 = vsel %vm330_vm7, %v329_v44, %v282_v45  ;;  %v674_v45 = vld [vmem:[%s1443_s11 + $0x60] sm:$0xff] }
 0x162   :  { %v333_v48 = vsel %vm332_vm8, %v331_v46, %v286_v43  ;;  %v673_v43 = vld [vmem:[%s1443_s11 + $0x58] sm:$0xff]  ;;  %v675_v46 = vld [vmem:[%s1443_s11 + $0x68] sm:$0xff] }
 0x163   :  { %v1003_v44 = vpack.c.bf16 %v673_v43, %v672_v42 }
 0x164   :  { %v294_v47 = vpop.permute.xlu0 %293  ;;  %v290_v22 = vpop.permute.xlu1 %289 }
 0x165   :  { %v335_v49 = vsel %vm334_vm9, %v333_v48, %v290_v22  ;;  %v676_v48 = vld [vmem:[%s1443_s11 + $0x70] sm:$0xff]  ;;  %v677_v22 = vld [vmem:[%s1443_s11 + $0x78] sm:$0xff] }
 0x166   :  { %v337_v51 = vsel %vm336_vm10, %v335_v49, %v294_v47  ;;  %v1006_v47 = vpack.c.bf16 %v675_v46, %v674_v45  ;;  %v1009_v49 = vpack.c.bf16 %v677_v22, %v676_v48 }
 0x168   :  { %v302_v50 = vpop.permute.xlu0 %301  ;;  %v298_v52 = vpop.permute.xlu1 %297 }
 0x169   :  { %v339_v53 = vsel %vm338_vm11, %v337_v51, %v298_v52 }
 0x16a   :  { %v341_v55 = vsel %vm340_vm12, %v339_v53, %v302_v50  ;;  %v785_v50 = vld [vmem:[%s1442_s10] ss:$0 sm:$0xff] }
 0x16c   :  { %v310_v54 = vpop.permute.xlu0 %309  ;;  %v306_v56 = vpop.permute.xlu1 %305 }
 0x16d   :  { %v342_v57 = vsel %vm66_vm0, %v341_v55, %v306_v56  ;;  %vm750_vm0 = vcmask 0  }
 0x16e   :  { %v344_v59 = vsel %vm343_vm13, %v342_v57, %v310_v54 }
 0x170   :  { %v318_v58 = vpop.permute.xlu0 %317  ;;  %v314_v60 = vpop.permute.xlu1 %313 }
 0x171   :  { %v346_v61 = vsel %vm345_vm14, %v344_v59, %v314_v60 }
 0x172   :  { %v348_v62 = vsel %vm347_vm15, %v346_v61, %v318_v58  ;;  %v678_v61 = vld [vmem:[#allocation2] sm:$0x1] }
 0x173   :  { %903 = vmatmul.mubr.msk.f32.vlgmr.msra.gmra.mrb[0].mxu1 %vm360_vm2, %v348_v62  ;;  %v679_v62 = vmul.f32 8.0, %v678_v61 }
 0x174   :  { %907 = vmatprep.mubr.msk.f32.mxu1 %vm1067_vm1, %v1068_v38 }
 0x181   :  { %v514_v9 = vpop.permute.xlu1 %513 }
 0x182   :  { %v527_v10 = vmul.f32 %v520_v5, %v514_v9  ;;  %v528_v11 = vmul.f32 %v524_v6, %v514_v9 }
 0x184   :  { %v541_v12 = vadd.f32 %v534_v7, %v527_v10  ;;  %v542_v13 = vadd.f32 %v538_v8, %v528_v11 }
 0x186   :  { %v543_v14 = vmax.f32 %v541_v12, 0.0  ;;  %v544_v15 = vmax.f32 %v542_v13, 0.0 }
 0x188   :  { %648 = vmatprep.mubr.f32.mxu0 %v544_v15 }
 0x189   :  { %649 = vmatmul.mubr.f32.vlgmr.msra.gmra.mrb[16].mxu0 %v543_v14 }
 0x246   :  { %v430_v17 = vpop.f32.mrb[0].mxu1 }
 0x247   :  { %v431_v20 = vadd.f32 %v782_v16, %v430_v17  ;;  %v904_v21 = vpop.f32.mrb[1].mxu1 }
 0x249   :  { %v434_v23 = vmax.f32 %v431_v20, 0.0 }
 0x24b   :  { %906 = vmatpush3.msra.mxu1 %v434_v23 }
 0x24c   :  { %908 = vmatmul.mubr.msk.f32.vlgmr.msra.gmra.mrb[2].mxu1 %vm326_vm5, %v435_v24  ;;  %987 = vmatprep.subr.bf16.mxu1 %v1062_v30 }
 0x24d   :  { %989 = vmatpush3.bf16.msra.mxu1 %v988_v25  ;;  %942 = vmatprep.mubr.msk.f32.mxu1 %vm1067_vm1, %v1068_v38  ;;  %v669_v38 = vld [vmem:[%s1443_s11 + $0x38] sm:$0xff]  ;;  %s1076_s11 = smov [#allocation3]  }
 0x24e   :  { %990 = vmatprep.subr.bf16.mxu1 %v1062_v30  ;;  %v997_v34 = vpack.c.bf16 %v669_v38, %v668_v33  ;;  %s758_s6 = sshll.u32 %s1076_s11, 4  ;;  %s759_s6 = int_to_ptr.vmem [resolvable:$true] %s758_s6 }
 0x24f   :  { %s1033_s10 = scalar_lea.vmem %s759_s6, 16  ;;  %s1037_s17 = scalar_lea.vmem %s759_s6, 32 }
 0x250   :  { %p1034_p0 = scmp.ne.s32.totalorder %s759_s6, %s1033_s10  ;;  %p1038_p1 = scmp.lt.s32.totalorder %s759_s6, %s759_s6 }
 0x251   :  { %992 = vmatpush3.bf16.msra.mxu1 %v991_v28  ;;  %p1039_p2 = scmp.lt.s32.totalorder %s1037_s17, %s1033_s10 }
 0x252   :  { %993 = vmatprep.subr.bf16.mxu1 %v1062_v30 }
 0x253   :  { %p1040_p3 = por %p1039_p2, %p1038_p1 }
 0x255   :  { %995 = vmatpush3.bf16.msra.mxu1 %v994_v32  ;;  %p1041_p4 = pnand %p1040_p3, %p1034_p0 }
 0x256   :  { %996 = vmatprep.subr.bf16.mxu1 %v1062_v30 }
 0x259   :  { %998 = vmatpush3.bf16.msra.mxu1 %v997_v34 }
 0x25a   :  { %999 = vmatprep.subr.bf16.mxu1 %v1062_v30 }
 0x25c   :  { %v844_v35 = vpop.f32.mrb[16].mxu0 }
 0x25d   :  { %v845_v36 = vpop.f32.mrb[17].mxu0  ;;  %1001 = vmatpush3.bf16.msra.mxu1 %v1000_v41 }
 0x25e   :  { %v846_v37 = vadd.f32 %v845_v36, %v844_v35  ;;  %1002 = vmatprep.subr.bf16.mxu1 %v1062_v30 }
 0x260   :  { %v651_v51 = vadd.f32 %v846_v37, %v785_v50 }
 0x261   :  { %1004 = vmatpush3.bf16.msra.mxu1 %v1003_v44 }
 0x262   :  { %1005 = vmatprep.subr.bf16.mxu1 %v1062_v30 }
 0x265   :  { %1007 = vmatpush3.bf16.msra.mxu1 %v1006_v47 }
 0x266   :  { %1008 = vmatprep.subr.bf16.mxu1 %v1062_v30 }
 0x269   :  { %1010 = vmatpush3.bf16.msra.mxu1 %v1009_v49 }
 0x31f   :  { %v505_v52 = vpop.f32.mrb[2].mxu1 }
 0x320   :  { %v654_v53 = vmul.f32 %v651_v51, %v505_v52  ;;  %v909_v54 = vpop.f32.mrb[3].mxu1 }
 0x322   :  { %v655_v55 = vmax.f32 %v654_v53, 0.0 }
 0x324   :  { %v656_v30 = vrot.slane %v655_v55, 4 }
 0x326   :  { %v657_v56 = vadd.f32 %v656_v30, %v655_v55 }
 0x328   :  { %v658_v57 = vrot.slane %v657_v56, 2 }
 0x32a   :  { %v659_v58 = vadd.f32 %v658_v57, %v657_v56 }
 0x32c   :  { %v660_v59 = vrot.slane %v659_v58, 1 }
 0x32e   :  { %v661_v60 = vadd.f32 %v660_v59, %v659_v58 }
 0x330   :  { %943 = vmatmul.mubr.f32.vlgmr.msra.gmra.mrb[4].mxu1 %v661_v60 }
 0x403   :  { %v746_v63 = vpop.f32.mrb[4].mxu1 }
 0x404   :  { %v747_v0 = vadd.f32 %v746_v63, %v679_v62  ;;  %v944_v1 = vpop.f32.mrb[5].mxu1 }
 0x406   :  { %751 = vst.msk [vmem:[#allocation3] sm:$0x1] %vm750_vm0, %v747_v0 }
 0x407   :  { %1044 = shalt.err (!%p1041_p4)
}
 0x408   :  { %s1045_s12 = scalar_lea.hbm %s1445_s13, 16 }
 0x409   :  { %p1046_p5 = scmp.ne.s32.totalorder %s1445_s13, %s1045_s12  ;;  %p1049_p6 = scmp.lt.u32.totalorder %s1045_s12, %s1445_s13 }
 0x40b   :  { %p1051_p7 = pnand %p1049_p6, %p1046_p5 }
 0x40d   :  { %1054 = shalt.err (!%p1051_p7)
}
 0x40e   :  { %761 = dma.vmem_to_hbm [thread:$0]  %s759_s6, 16, %s1445_s13, [#allocation4]  }
 0x40f   :  { %1055 = dma.done.wait [#allocation4], 16  }
 0x410   :  { %1056 = vsyncadd [#allocation4], 4294967280 }
 0x411   :  { %765 = vsyncpa [#allocation4], 1 }

</bundles_post_ra>
